<compile_context>
chip_gen: v7x
topology: tpu7x:2x2x1
jax: 0.10.0
libtpu: 0.0.40
codegen_flags: <defaults>
</compile_context>

<pallas_src>
import jax
import jax.numpy as jnp
from jax.experimental import pallas as pl
from jax.experimental.pallas import tpu as pltpu

IN_FEATURES = 784            # 1 * 28 * 28
HIDDEN_UNITS = 100
H_PAD = 128                  # padded hidden axis (lane-aligned)


def _round_up(x, m):
    return (x + m - 1) // m * m


def autoencoder_kernel(x_ref, w1_ref, b1_ref, w2_ref, b2_ref, o_ref):
    # hidden = ReLU(x @ W1 + b1)      -- bf16 matmul, f32 accumulate
    x = x_ref[...].astype(jnp.bfloat16)
    h = jnp.dot(x, w1_ref[...], preferred_element_type=jnp.float32)
    h = jnp.maximum(h + b1_ref[...], 0.0)               # (bm, H_PAD) + (1, H_PAD)
    # out = sigmoid(hidden @ W2 + b2) -- bf16 matmul, f32 accumulate
    y = jnp.dot(h.astype(jnp.bfloat16), w2_ref[...],
                preferred_element_type=jnp.float32)
    o_ref[...] = jax.nn.sigmoid(y + b2_ref[...]).astype(o_ref.dtype)


def prepare_params(w1, b1, w2, b2):
    """Pad only the hidden axis (100 -> 128); weights -> bf16, biases -> f32.

    Inputs are in (in_features, out_features) layout:
      w1: (784, 100), b1: (100,), w2: (100, 784), b2: (784,)
    """
    w1p = jnp.zeros((IN_FEATURES, H_PAD), jnp.bfloat16).at[:, :HIDDEN_UNITS].set(
        w1.astype(jnp.bfloat16))
    b1p = jnp.zeros((1, H_PAD), jnp.float32).at[0, :HIDDEN_UNITS].set(
        b1.reshape(-1).astype(jnp.float32))
    w2p = jnp.zeros((H_PAD, IN_FEATURES), jnp.bfloat16).at[:HIDDEN_UNITS, :].set(
        w2.astype(jnp.bfloat16))
    b2p = b2.reshape(1, IN_FEATURES).astype(jnp.float32)
    return w1p, b1p, w2p, b2p


def autoencoder_forward(x, params, *, block_m=1024):
    """x: (B, 1, 28, 28) float32 (or bfloat16) -> (B, 1, 28, 28) float32."""
    w1p, b1p, w2p, b2p = params
    batch = x.shape[0]
    x_flat = x.reshape(batch, IN_FEATURES)               # x.view(-1, 784); no pad, no cast

    # Batch tiling: no over-padding.  For mid-size batches split into >= 2
    # blocks so v7x's second TensorCore gets work via "parallel" semantics.
    n_blocks = pl.cdiv(batch, block_m)
    if n_blocks == 1 and batch >= 256:
        n_blocks = 2
    if n_blocks == 1:
        bm = batch                                       # full-dim block: always legal
    else:
        bm = _round_up(pl.cdiv(batch, n_blocks), 16)     # packed bf16 sublanes
    grid = (pl.cdiv(batch, bm),)                         # edge block masked by Pallas

    cost = pl.CostEstimate(
        flops=4 * batch * IN_FEATURES * H_PAD,           # two matmuls
        transcendentals=batch * IN_FEATURES,             # sigmoid exp
        bytes_accessed=(x_flat.size * x_flat.dtype.itemsize
                        + batch * IN_FEATURES * 4
                        + w1p.size * 2 + w2p.size * 2
                        + b1p.size * 4 + b2p.size * 4),
    )

    out = pl.pallas_call(
        autoencoder_kernel,
        out_shape=jax.ShapeDtypeStruct((batch, IN_FEATURES), jnp.float32),
        grid=grid,
        in_specs=[
            pl.BlockSpec((bm, IN_FEATURES), lambda i: (i, 0)),       # x tile (streamed)
            pl.BlockSpec((IN_FEATURES, H_PAD), lambda i: (0, 0)),    # W1 (resident)
            pl.BlockSpec((1, H_PAD), lambda i: (0, 0)),              # b1 (resident)
            pl.BlockSpec((H_PAD, IN_FEATURES), lambda i: (0, 0)),    # W2 (resident)
            pl.BlockSpec((1, IN_FEATURES), lambda i: (0, 0)),        # b2 (resident)
        ],
        out_specs=pl.BlockSpec((bm, IN_FEATURES), lambda i: (i, 0)),
        compiler_params=pltpu.CompilerParams(
            dimension_semantics=("parallel",),            # megacore batch split
            vmem_limit_bytes=48 * 1024 * 1024,            # bm=1024 f32 fits on v5e too
        ),
        cost_estimate=cost,
    )(x_flat, w1p, b1p, w2p, b2p)

    return out.reshape(batch, 1, 28, 28)                  # x.view(-1, 1, 28, 28)


def init_params(key):
    """nn.Linear-style U(-1/sqrt(fan_in), 1/sqrt(fan_in)) init.
    Weights stored as (in_features, out_features) so the kernel computes x @ W."""
    k1, k2, k3, k4 = jax.random.split(key, 4)
    bound1 = 1.0 / jnp.sqrt(IN_FEATURES)
    bound2 = 1.0 / jnp.sqrt(HIDDEN_UNITS)
    w1 = jax.random.uniform(k1, (IN_FEATURES, HIDDEN_UNITS),
                            minval=-bound1, maxval=bound1, dtype=jnp.float32)
    b1 = jax.random.uniform(k2, (HIDDEN_UNITS,),
                            minval=-bound1, maxval=bound1, dtype=jnp.float32)
    w2 = jax.random.uniform(k3, (HIDDEN_UNITS, IN_FEATURES),
                            minval=-bound2, maxval=bound2, dtype=jnp.float32)
    b2 = jax.random.uniform(k4, (IN_FEATURES,),
                            minval=-bound2, maxval=bound2, dtype=jnp.float32)
    return w1, b1, w2, b2


def _reference(x, w1, b1, w2, b2):
    """Pure-JAX reference with the same bf16-matmul / f32-accumulate precision."""
    batch = x.shape[0]
    xf = x.reshape(batch, IN_FEATURES)
    h = jnp.maximum(
        jnp.dot(xf.astype(jnp.bfloat16), w1.astype(jnp.bfloat16),
                preferred_element_type=jnp.float32) + b1, 0.0)
    y = jnp.dot(h.astype(jnp.bfloat16), w2.astype(jnp.bfloat16),
                preferred_element_type=jnp.float32) + b2
    return jax.nn.sigmoid(y).reshape(batch, 1, 28, 28)


if __name__ == "__main__":
    key = jax.random.PRNGKey(0)
    k_x, k_x2, k_p = jax.random.split(key, 3)

    w1, b1, w2, b2 = init_params(k_p)
    params = prepare_params(w1, b1, w2, b2)

    # Small single-block case (batch=8).
    x = jax.random.uniform(k_x, (8, 1, 28, 28), dtype=jnp.float32)
    out = jax.block_until_ready(autoencoder_forward(x, params))
    assert out.shape == (8, 1, 28, 28)
    ref = _reference(x, w1, b1, w2, b2)
    assert jnp.allclose(out, ref, atol=5e-3, rtol=5e-3), \
        float(jnp.max(jnp.abs(out - ref)))

    # Multi-block case with a masked edge block (batch=300 -> 2 blocks of 160).
    x2 = jax.random.uniform(k_x2, (300, 1, 28, 28), dtype=jnp.float32)
    out2 = jax.block_until_ready(autoencoder_forward(x2, params))
    assert out2.shape == (300, 1, 28, 28)
    ref2 = _reference(x2, w1, b1, w2, b2)
    assert jnp.allclose(out2, ref2, atol=5e-3, rtol=5e-3), \
        float(jnp.max(jnp.abs(out2 - ref2)))

    print("KERNEL_OK")
</pallas_src>

<mosaic_0001>
module attributes {stable_mosaic.version = 11 : i64} {
  func.func @autoencoder_kernel(%arg0: i32, %arg1: memref<8x784xf32, #tpu.memory_space<vmem>>, %arg2: memref<784x128xbf16, #tpu.memory_space<vmem>>, %arg3: memref<1x128xf32, #tpu.memory_space<vmem>>, %arg4: memref<128x784xbf16, #tpu.memory_space<vmem>>, %arg5: memref<1x784xf32, #tpu.memory_space<vmem>>, %arg6: memref<8x784xf32, #tpu.memory_space<vmem>>) attributes {dimension_semantics = [#tpu.dimension_semantics<parallel>], iteration_bounds = array<i64: 1>, scalar_prefetch = 0 : i64, scratch_operands = 0 : i64, tpu.core_type = #tpu.core_type<tc>, window_params = [{transform_indices = @transform_0, window_bounds = array<i64: 8, 784>}, {pipeline_mode = #tpu.pipeline_mode<synchronous>, transform_indices = @transform_1, window_bounds = array<i64: 784, 128>}, {pipeline_mode = #tpu.pipeline_mode<synchronous>, transform_indices = @transform_2, window_bounds = array<i64: 1, 128>}, {pipeline_mode = #tpu.pipeline_mode<synchronous>, transform_indices = @transform_3, window_bounds = array<i64: 128, 784>}, {pipeline_mode = #tpu.pipeline_mode<synchronous>, transform_indices = @transform_4, window_bounds = array<i64: 1, 784>}, {transform_indices = @transform_5, window_bounds = array<i64: 8, 784>}]} {
    %c0 = arith.constant 0 : index
    %c0_0 = arith.constant 0 : index
    %0 = vector.load %arg1[%c0, %c0_0] : memref<8x784xf32, #tpu.memory_space<vmem>>, vector<8x784xf32>
    %1 = arith.truncf %0 : vector<8x784xf32> to vector<8x784xbf16>
    %c0_1 = arith.constant 0 : index
    %c0_2 = arith.constant 0 : index
    %2 = vector.load %arg2[%c0_1, %c0_2] : memref<784x128xbf16, #tpu.memory_space<vmem>>, vector<784x128xbf16>
    %cst = arith.constant dense<0.000000e+00> : vector<8x128xf32>
    %3 = tpu.matmul %1, %2, %cst {dimension_numbers = #tpu.dot_dimension_numbers<[1], [0], [0], [1], [0, 0, 1, 1], [], []>} : vector<8x784xbf16>, vector<784x128xbf16>, vector<8x128xf32> -> vector<8x128xf32>
    %c0_3 = arith.constant 0 : index
    %c0_4 = arith.constant 0 : index
    %4 = vector.load %arg3[%c0_3, %c0_4] : memref<1x128xf32, #tpu.memory_space<vmem>>, vector<1x128xf32>
    %5 = vector.broadcast %4 : vector<1x128xf32> to vector<8x128xf32>
    %6 = arith.addf %3, %5 : vector<8x128xf32>
    %cst_5 = arith.constant 0.000000e+00 : f32
    %7 = vector.broadcast %cst_5 : f32 to vector<8x128xf32>
    %8 = arith.maximumf %6, %7 : vector<8x128xf32>
    %9 = arith.truncf %8 : vector<8x128xf32> to vector<8x128xbf16>
    %c0_6 = arith.constant 0 : index
    %c0_7 = arith.constant 0 : index
    %10 = vector.load %arg4[%c0_6, %c0_7] : memref<128x784xbf16, #tpu.memory_space<vmem>>, vector<128x784xbf16>
    %cst_8 = arith.constant dense<0.000000e+00> : vector<8x784xf32>
    %11 = tpu.matmul %9, %10, %cst_8 {dimension_numbers = #tpu.dot_dimension_numbers<[1], [0], [0], [1], [0, 0, 1, 1], [], []>} : vector<8x128xbf16>, vector<128x784xbf16>, vector<8x784xf32> -> vector<8x784xf32>
    %c0_9 = arith.constant 0 : index
    %c0_10 = arith.constant 0 : index
    %12 = vector.load %arg5[%c0_9, %c0_10] : memref<1x784xf32, #tpu.memory_space<vmem>>, vector<1x784xf32>
    %13 = vector.broadcast %12 : vector<1x784xf32> to vector<8x784xf32>
    %14 = arith.addf %11, %13 : vector<8x784xf32>
    %15 = arith.negf %14 : vector<8x784xf32>
    %16 = math.exp %15 : vector<8x784xf32>
    %cst_11 = arith.constant 1.000000e+00 : f32
    %17 = vector.broadcast %cst_11 : f32 to vector<8x784xf32>
    %18 = arith.addf %17, %16 : vector<8x784xf32>
    %19 = arith.divf %17, %18 : vector<8x784xf32>
    %c0_12 = arith.constant 0 : index
    %c0_13 = arith.constant 0 : index
    %20 = vector.load %arg6[%c0_12, %c0_13] : memref<8x784xf32, #tpu.memory_space<vmem>>, vector<8x784xf32>
    tpu.vector_store %arg6[%c0_12, %c0_13], %19 {strides = array<i32>} : memref<8x784xf32, #tpu.memory_space<vmem>>, vector<8x784xf32>,
    return
  }
  func.func @transform_0(%arg0: i32) -> (i32, i32) {
    %c0_i32 = arith.constant 0 : i32
    %c0_i32_0 = arith.constant 0 : i32
    return %arg0, %c0_i32 : i32, i32
  }
  func.func @transform_1(%arg0: i32) -> (i32, i32) {
    %c0_i32 = arith.constant 0 : i32
    %c0_i32_0 = arith.constant 0 : i32
    %c0_i32_1 = arith.constant 0 : i32
    return %c0_i32, %c0_i32_0 : i32, i32
  }
  func.func @transform_2(%arg0: i32) -> (i32, i32) {
    %c0_i32 = arith.constant 0 : i32
    %c0_i32_0 = arith.constant 0 : i32
    %c0_i32_1 = arith.constant 0 : i32
    return %c0_i32, %c0_i32_0 : i32, i32
  }
  func.func @transform_3(%arg0: i32) -> (i32, i32) {
    %c0_i32 = arith.constant 0 : i32
    %c0_i32_0 = arith.constant 0 : i32
    %c0_i32_1 = arith.constant 0 : i32
    return %c0_i32, %c0_i32_0 : i32, i32
  }
  func.func @transform_4(%arg0: i32) -> (i32, i32) {
    %c0_i32 = arith.constant 0 : i32
    %c0_i32_0 = arith.constant 0 : i32
    %c0_i32_1 = arith.constant 0 : i32
    return %c0_i32, %c0_i32_0 : i32, i32
  }
  func.func @transform_5(%arg0: i32) -> (i32, i32) {
    %c0_i32 = arith.constant 0 : i32
    %c0_i32_0 = arith.constant 0 : i32
    return %arg0, %c0_i32 : i32, i32
  }
}

</mosaic_0001>

<bundles_post_ra>
// kernel: tpu_custom_call.1
= control target key start
LH: loop header
LB: loop body
LE: loop exit
PB: predicated region body
PF: predicated region fallthrough
CT: control target
= control target key end

     0   :  { %v1618_v44 = vmov 0.0   ;;  %vm1619_vm0 = vmmov 0   ;;  %vm435_vm1 = vcmask 130048   ;;  %s2021_s0 = inlined_call_operand.vmem [shape: f32[8,784], index: 0, kind: input, shape index: {}]   ;;  %s2022_s1 = inlined_call_operand.vmem [shape: bf16[784,128], index: 1, kind: input, shape index: {}]   ;;  %s2023_s2 = inlined_call_operand.vmem [shape: f32[1,128], index: 2, kind: input, shape index: {}]   ;;  %s2024_s3 = inlined_call_operand.vmem [shape: bf16[128,784], index: 3, kind: input, shape index: {}]   ;;  %s2025_s4 = inlined_call_operand.vmem [shape: f32[1,784], index: 4, kind: input, shape index: {}]   ;;  %s2026_s5 = inlined_call_operand.hbm [shape: f32[8,784], index: 5, kind: output, shape index: {}]  }
   0x1   :  { %v1437_v0 = vld [vmem:[%s2022_s1 + $0x40] sm:$0xff]   ;;  %v1441_v4 = vld [vmem:[%s2022_s1 + $0x48] sm:$0xff]   ;;  %v1445_v8 = vld [vmem:[%s2022_s1 + $0x50] sm:$0xff]  }
   0x2   :  { %v1438_v1 = vld [vmem:[%s2022_s1] sm:$0xff]   ;;  %1330 = vmatprep.subr.bf16.mxu0 %v1437_v0  ;;  %v1442_v5 = vld [vmem:[%s2022_s1 + $0x8] sm:$0xff]   ;;  %v1446_v9 = vld [vmem:[%s2022_s1 + $0x10] sm:$0xff]  }
   0x3   :  { %v1439_v2 = vld [vmem:[%s2022_s1 + $0xc0] sm:$0xff]   ;;  %1331 = vmatpush3.bf16.msra.mxu0 %v1438_v1  ;;  %v1443_v6 = vld [vmem:[%s2022_s1 + $0xc8] sm:$0xff]   ;;  %v1447_v10 = vld [vmem:[%s2022_s1 + $0xd0] sm:$0xff]  }
   0x4   :  { %v1440_v3 = vld [vmem:[%s2022_s1 + $0x80] sm:$0xff]   ;;  %1352 = vmatprep.subr.bf16.mxu1 %v1439_v2  ;;  %1332 = vmatprep.subr.bf16.mxu0 %v1441_v4  ;;  %v1444_v7 = vld [vmem:[%s2022_s1 + $0x88] sm:$0xff]   ;;  %v1448_v11 = vld [vmem:[%s2022_s1 + $0x90] sm:$0xff]  }
   0x5   :  { %1353 = vmatpush3.bf16.msra.mxu1 %v1440_v3  ;;  %v1449_v12 = vld [vmem:[%s2022_s1 + $0x58] sm:$0xff]   ;;  %v1453_v16 = vld [vmem:[%s2022_s1 + $0x60] sm:$0xff]   ;;  %v1457_v20 = vld [vmem:[%s2022_s1 + $0x68] sm:$0xff]  }
   0x6   :  { %1354 = vmatprep.subr.bf16.mxu1 %v1443_v6  ;;  %v1450_v13 = vld [vmem:[%s2022_s1 + $0x18] sm:$0xff]   ;;  %v1454_v17 = vld [vmem:[%s2022_s1 + $0x20] sm:$0xff]   ;;  %v1458_v21 = vld [vmem:[%s2022_s1 + $0x28] sm:$0xff]  }
   0x7   :  { %1333 = vmatpush3.bf16.msra.mxu0 %v1442_v5  ;;  %v1451_v14 = vld [vmem:[%s2022_s1 + $0xd8] sm:$0xff]   ;;  %v1455_v18 = vld [vmem:[%s2022_s1 + $0xe0] sm:$0xff]   ;;  %v1459_v22 = vld [vmem:[%s2022_s1 + $0xe8] sm:$0xff]  }
   0x8   :  { %1334 = vmatprep.subr.bf16.mxu0 %v1445_v8  ;;  %v1452_v15 = vld [vmem:[%s2022_s1 + $0x98] sm:$0xff]   ;;  %v1456_v19 = vld [vmem:[%s2022_s1 + $0xa0] sm:$0xff]   ;;  %v1460_v23 = vld [vmem:[%s2022_s1 + $0xa8] sm:$0xff]  }
   0x9   :  { %1355 = vmatpush3.bf16.msra.mxu1 %v1444_v7  ;;  %v1461_v24 = vld [vmem:[%s2022_s1 + $0x70] sm:$0xff]   ;;  %v1465_v28 = vld [vmem:[%s2022_s1 + $0x78] sm:$0xff]   ;;  %v23_v31 = vld [vmem:[%s2021_s0 + $0x8] sm:$0xff] }
   0xa   :  { %1356 = vmatprep.subr.bf16.mxu1 %v1447_v10  ;;  %v1462_v25 = vld [vmem:[%s2022_s1 + $0x30] sm:$0xff]   ;;  %v1466_v29 = vld [vmem:[%s2022_s1 + $0x38] sm:$0xff]   ;;  %v30_v32 = vpack.c.bf16 %v23_v31, %v23_v31  ;;  %v22_v34 = vld [vmem:[%s2021_s0] sm:$0xff] }
   0xb   :  { %1335 = vmatpush3.bf16.msra.mxu0 %v1446_v9  ;;  %v1463_v26 = vld [vmem:[%s2022_s1 + $0xf0] sm:$0xff]   ;;  %v1467_v30 = vld [vmem:[%s2022_s1 + $0xf8] sm:$0xff]   ;;  %v29_v35 = vpack.c.bf16 %v22_v34, %v22_v34  ;;  %v1469_v36 = vld [vmem:[%s2022_s1 + $0x140] sm:$0xff]  }
   0xc   :  { %1336 = vmatprep.subr.bf16.mxu0 %v1449_v12  ;;  %v1464_v27 = vld [vmem:[%s2022_s1 + $0xb0] sm:$0xff]   ;;  %v1468_v33 = vld [vmem:[%s2022_s1 + $0xb8] sm:$0xff]   ;;  %471 = vmatprep.mubr.bf16.mxu0 %v30_v32  ;;  %v1470_v39 = vld [vmem:[%s2022_s1 + $0x100] sm:$0xff]  }
   0xd   :  { %1357 = vmatpush3.bf16.msra.mxu1 %v1448_v11  ;;  %v25_v37 = vld [vmem:[%s2021_s0 + $0x18] sm:$0xff]  ;;  %v24_v40 = vld [vmem:[%s2021_s0 + $0x10] sm:$0xff]  ;;  %v1471_v42 = vld [vmem:[%s2022_s1 + $0x148] sm:$0xff]  }
   0xe   :  { %1358 = vmatprep.subr.bf16.mxu1 %v1451_v14  ;;  %v32_v38 = vpack.c.bf16 %v25_v37, %v25_v37  ;;  %v31_v41 = vpack.c.bf16 %v24_v40, %v24_v40  ;;  %v1472_v43 = vld [vmem:[%s2022_s1 + $0x108] sm:$0xff]   ;;  %v1473_v45 = vld [vmem:[%s2022_s1 + $0x150] sm:$0xff]   ;;  %v1475_v47 = vld [vmem:[%s2022_s1 + $0x158] sm:$0xff]  }
   0xf   :  { %1337 = vmatpush3.bf16.msra.mxu0 %v1450_v13  ;;  %v1474_v46 = vld [vmem:[%s2022_s1 + $0x110] sm:$0xff]   ;;  %v1476_v48 = vld [vmem:[%s2022_s1 + $0x118] sm:$0xff]   ;;  %v1477_v49 = vld [vmem:[%s2022_s1 + $0x160] sm:$0xff]  }
  0x10   :  { %1338 = vmatprep.subr.bf16.mxu0 %v1453_v16  ;;  %511 = vmatprep.mubr.bf16.mxu1 %v32_v38  ;;  %v1478_v50 = vld [vmem:[%s2022_s1 + $0x120] sm:$0xff]   ;;  %v1479_v51 = vld [vmem:[%s2022_s1 + $0x168] sm:$0xff]   ;;  %v1481_v55 = vld [vmem:[%s2022_s1 + $0x170] sm:$0xff]  }
  0x11   :  { %1359 = vmatpush3.bf16.msra.mxu1 %v1452_v15  ;;  %v1480_v52 = vld [vmem:[%s2022_s1 + $0x128] sm:$0xff]   ;;  %v1485_v53 = vld [vmem:[%s2022_s1 + $0x180] sm:$0xff]   ;;  %v28_v57 = vld [vmem:[%s2021_s0 + $0x30] sm:$0xff] }
  0x12   :  { %1360 = vmatprep.subr.bf16.mxu1 %v1455_v18  ;;  %v27_v54 = vld [vmem:[%s2021_s0 + $0x28] sm:$0xff]  ;;  %v35_v58 = vpack.c.bf16 %v28_v57, %v28_v57  ;;  %v1482_v59 = vld [vmem:[%s2022_s1 + $0x130] sm:$0xff]   ;;  %v1483_v60 = vld [vmem:[%s2022_s1 + $0x178] sm:$0xff]  }
  0x13   :  { %1339 = vmatpush3.bf16.msra.mxu0 %v1454_v17  ;;  %v34_v56 = vpack.c.bf16 %v27_v54, %v27_v54  ;;  %v1484_v61 = vld [vmem:[%s2022_s1 + $0x138] sm:$0xff]   ;;  %v26_v62 = vld [vmem:[%s2021_s0 + $0x20] sm:$0xff] }
  0x14   :  { %1340 = vmatprep.subr.bf16.mxu0 %v1457_v20  ;;  %v33_v63 = vpack.c.bf16 %v26_v62, %v26_v62 }
  0x15   :  { %1361 = vmatpush3.bf16.msra.mxu1 %v1456_v19 }
  0x16   :  { %1362 = vmatprep.subr.bf16.mxu1 %v1459_v22 }
  0x17   :  { %1341 = vmatpush3.bf16.msra.mxu0 %v1458_v21 }
  0x18   :  { %1342 = vmatprep.subr.bf16.mxu0 %v1461_v24 }
  0x19   :  { %1363 = vmatpush3.bf16.msra.mxu1 %v1460_v23 }
  0x1a   :  { %1364 = vmatprep.subr.bf16.mxu1 %v1463_v26 }
  0x1b   :  { %1343 = vmatpush3.bf16.msra.mxu0 %v1462_v25 }
  0x1c   :  { %1344 = vmatprep.subr.bf16.mxu0 %v1465_v28 }
  0x1d   :  { %1365 = vmatpush3.bf16.msra.mxu1 %v1464_v27 }
  0x1e   :  { %1366 = vmatprep.subr.bf16.mxu1 %v1467_v30 }
  0x1f   :  { %1345 = vmatpush3.bf16.msra.mxu0 %v1466_v29 }
  0x20   :  { %1374 = vmatprep.subr.bf16.mxu0 %v1469_v36 }
  0x21   :  { %1367 = vmatpush3.bf16.msra.mxu1 %v1468_v33 }
  0x22   :  { %472 = vmatmul.mubr.bf16.vlgmr.msra.gmra.mrb[0].mxu0 %v29_v35  ;;  %1407 = vmatprep.subr.bf16.mxu1 %v1618_v44 }
  0x23   :  { %1375 = vmatpush3.bf16.msra.mxu0 %v1470_v39  ;;  %551 = vmatprep.mubr.bf16.mxu0 %v34_v56 }
  0x24   :  { %512 = vmatmul.mubr.bf16.vlgmr.msra.gmra.mrb[0].mxu1 %v31_v41  ;;  %1376 = vmatprep.subr.bf16.mxu0 %v1471_v42 }
  0x25   :  { %1409 = vmatprep.mubr.msk.bf16.mxu1 %vm1619_vm0, %v1618_v44  ;;  %1408 = vmatpush3.bf16.msra.mxu1 %v1485_v53 }
  0x27   :  { %1377 = vmatpush3.bf16.msra.mxu0 %v1472_v43 }
  0x28   :  { %1378 = vmatprep.subr.bf16.mxu0 %v1473_v45 }
  0x2b   :  { %1379 = vmatpush3.bf16.msra.mxu0 %v1474_v46 }
  0x2c   :  { %1380 = vmatprep.subr.bf16.mxu0 %v1475_v47  ;;  %1410 = vmatmul.mubr.msk.bf16.vlgmr.msra.gmra.mrb[4].mxu1 %vm435_vm1, %v35_v58 }
  0x2f   :  { %1381 = vmatpush3.bf16.msra.mxu0 %v1476_v48 }
  0x30   :  { %1382 = vmatprep.subr.bf16.mxu0 %v1477_v49 }
  0x33   :  { %1383 = vmatpush3.bf16.msra.mxu0 %v1478_v50 }
  0x34   :  { %1384 = vmatprep.subr.bf16.mxu0 %v1479_v51 }
  0x37   :  { %1385 = vmatpush3.bf16.msra.mxu0 %v1480_v52 }
  0x38   :  { %1386 = vmatprep.subr.bf16.mxu0 %v1481_v55 }
  0x3b   :  { %1387 = vmatpush3.bf16.msra.mxu0 %v1482_v59 }
  0x3c   :  { %1388 = vmatprep.subr.bf16.mxu0 %v1483_v60 }
  0x3f   :  { %1389 = vmatpush3.bf16.msra.mxu0 %v1484_v61 }
  0x42   :  { %552 = vmatmul.mubr.bf16.vlgmr.msra.gmra.mrb[4].mxu0 %v33_v63 }
  0x43   :  { %10 = vsyncpa [#allocation3], 0  ;;  %v1486_v0 = vld [vmem:[%s2024_s3] ss:$28 sps:$4 sm:$0xff]   ;;  %v1489_v2 = vld [vmem:[%s2024_s3 + $0x8] ss:$28 sps:$4 sm:$0xff]  }
  0x44   :  { %v1488_v1 = vld [vmem:[%s2024_s3 + $0x4] ss:$28 sps:$4 sm:$0xff]   ;;  %v1491_v3 = vld [vmem:[%s2024_s3 + $0xc] ss:$28 sps:$4 sm:$0xff]   ;;  %v1494_v4 = vld [vmem:[%s2024_s3 + $0x3c] ss:$28 sps:$4 sm:$0xff]  }
  0x45   :  { %990 = vmatprep.subr.bf16.mxu1 %v1488_v1  ;;  %v1497_v5 = vld [vmem:[%s2024_s3 + $0x44] ss:$28 sps:$4 sm:$0xff]   ;;  %1031 = vmatprep.subr.bf16.mxu0 %v1491_v3  ;;  %v1492_v6 = vld [vmem:[%s2024_s3 + $0x38] ss:$28 sps:$4 sm:$0xff]   ;;  %v1498_v10 = vld [vmem:[%s2024_s3 + $0x70] ss:$28 sps:$4 sm:$0xff]  }
  0x46   :  { %991 = vmatpush1.bf16.msra.mxu1 %v1486_v0  ;;  %1032 = vmatpush1.bf16.msra.mxu0 %v1489_v2  ;;  %v1495_v7 = vld [vmem:[%s2024_s3 + $0x40] ss:$28 sps:$4 sm:$0xff]   ;;  %v1500_v8 = vld [vmem:[%s2024_s3 + $0x74] ss:$28 sps:$4 sm:$0xff]   ;;  %v1506_v12 = vld [vmem:[%s2024_s3 + $0xac] ss:$28 sps:$4 sm:$0xff]  }
  0x47   :  { %992 = vmatprep.subr.bf16.mxu1 %v1494_v4  ;;  %1033 = vmatprep.subr.bf16.mxu0 %v1497_v5  ;;  %v1503_v9 = vld [vmem:[%s2024_s3 + $0x7c] ss:$28 sps:$4 sm:$0xff]   ;;  %v1509_v13 = vld [vmem:[%s2024_s3 + $0xb4] ss:$28 sps:$4 sm:$0xff]   ;;  %v1504_v14 = vld [vmem:[%s2024_s3 + $0xa8] ss:$28 sps:$4 sm:$0xff]  }
  0x48   :  { %v1501_v11 = vld [vmem:[%s2024_s3 + $0x78] ss:$28 sps:$4 sm:$0xff]   ;;  %v1507_v15 = vld [vmem:[%s2024_s3 + $0xb0] ss:$28 sps:$4 sm:$0xff]   ;;  %v1512_v16 = vld [vmem:[%s2024_s3 + $0xe4] ss:$28 sps:$4 sm:$0xff]  }
  0x49   :  { %v1515_v17 = vld [vmem:[%s2024_s3 + $0xec] ss:$28 sps:$4 sm:$0xff]   ;;  %v1510_v18 = vld [vmem:[%s2024_s3 + $0xe0] ss:$28 sps:$4 sm:$0xff]   ;;  %v1516_v22 = vld [vmem:[%s2024_s3 + $0x118] ss:$28 sps:$4 sm:$0xff]  }
  0x4a   :  { %993 = vmatpush1.bf16.msra.mxu1 %v1492_v6  ;;  %1034 = vmatpush1.bf16.msra.mxu0 %v1495_v7  ;;  %v1513_v19 = vld [vmem:[%s2024_s3 + $0xe8] ss:$28 sps:$4 sm:$0xff]   ;;  %v1518_v20 = vld [vmem:[%s2024_s3 + $0x11c] ss:$28 sps:$4 sm:$0xff]   ;;  %v1524_v24 = vld [vmem:[%s2024_s3 + $0x154] ss:$28 sps:$4 sm:$0xff]  }
  0x4b   :  { %994 = vmatprep.subr.bf16.mxu1 %v1500_v8  ;;  %1035 = vmatprep.subr.bf16.mxu0 %v1503_v9  ;;  %v1521_v21 = vld [vmem:[%s2024_s3 + $0x124] ss:$28 sps:$4 sm:$0xff]   ;;  %v1527_v25 = vld [vmem:[%s2024_s3 + $0x15c] ss:$28 sps:$4 sm:$0xff]   ;;  %v1522_v26 = vld [vmem:[%s2024_s3 + $0x150] ss:$28 sps:$4 sm:$0xff]  }
  0x4c   :  { %v1519_v23 = vld [vmem:[%s2024_s3 + $0x120] ss:$28 sps:$4 sm:$0xff]   ;;  %v1525_v27 = vld [vmem:[%s2024_s3 + $0x158] ss:$28 sps:$4 sm:$0xff]   ;;  %v1530_v28 = vld [vmem:[%s2024_s3 + $0x18c] ss:$28 sps:$4 sm:$0xff]  }
  0x4d   :  { %v1533_v29 = vld [vmem:[%s2024_s3 + $0x194] ss:$28 sps:$4 sm:$0xff]   ;;  %v1528_v30 = vld [vmem:[%s2024_s3 + $0x188] ss:$28 sps:$4 sm:$0xff]   ;;  %v1620_v33 = vmov 0  }
  0x4e   :  { %995 = vmatpush1.bf16.msra.mxu1 %v1498_v10  ;;  %1036 = vmatpush1.bf16.msra.mxu0 %v1501_v11  ;;  %v1531_v31 = vld [vmem:[%s2024_s3 + $0x190] ss:$28 sps:$4 sm:$0xff]   ;;  %v1216_v35 = vld [vmem:[%s2023_s2] ss:$0 sm:$0xff]  ;;  %v1537_v61 = vld [vmem:[%s2024_s3 + $0x18] ss:$28 sps:$4 sm:$0xff]  }
  0x4f   :  { %996 = vmatprep.subr.bf16.mxu1 %v1506_v12  ;;  %1037 = vmatprep.subr.bf16.mxu0 %v1509_v13  ;;  %v1536_v32 = vld [vmem:[%s2024_s3 + $0x14] ss:$28 sps:$4 sm:$0xff]   ;;  %v1540_v63 = vld [vmem:[%s2024_s3 + $0x4c] ss:$28 sps:$4 sm:$0xff]   ;;  %v1544_v2 = vld [vmem:[%s2024_s3 + $0x84] ss:$28 sps:$4 sm:$0xff]  }
  0x50   :  { %1022 = vmatprep.mubr.bf16.mxu1 %v1620_v33  ;;  %1063 = vmatprep.mubr.bf16.mxu0 %v1620_v33  ;;  %v1534_v60 = vld [vmem:[%s2024_s3 + $0x10] ss:$28 sps:$4 sm:$0xff]   ;;  %v1538_v0 = vld [vmem:[%s2024_s3 + $0x48] ss:$28 sps:$4 sm:$0xff]   ;;  %v1542_v3 = vld [vmem:[%s2024_s3 + $0x80] ss:$28 sps:$4 sm:$0xff]  }
  0x51   :  { %v1541_v1 = vld [vmem:[%s2024_s3 + $0x50] ss:$28 sps:$4 sm:$0xff]   ;;  %v1545_v4 = vld [vmem:[%s2024_s3 + $0x88] ss:$28 sps:$4 sm:$0xff]   ;;  %v1548_v5 = vld [vmem:[%s2024_s3 + $0xbc] ss:$28 sps:$4 sm:$0xff]  }
  0x52   :  { %997 = vmatpush1.bf16.msra.mxu1 %v1504_v14  ;;  %1038 = vmatpush1.bf16.msra.mxu0 %v1507_v15  ;;  %v1546_v6 = vld [vmem:[%s2024_s3 + $0xb8] ss:$28 sps:$4 sm:$0xff]   ;;  %v1549_v7 = vld [vmem:[%s2024_s3 + $0xc0] ss:$28 sps:$4 sm:$0xff]   ;;  %v1550_v9 = vld [vmem:[%s2024_s3 + $0xf0] ss:$28 sps:$4 sm:$0xff]  }
  0x53   :  { %998 = vmatprep.subr.bf16.mxu1 %v1512_v16  ;;  %1039 = vmatprep.subr.bf16.mxu0 %v1515_v17  ;;  %v1552_v8 = vld [vmem:[%s2024_s3 + $0xf4] ss:$28 sps:$4 sm:$0xff]   ;;  %v1556_v11 = vld [vmem:[%s2024_s3 + $0x12c] ss:$28 sps:$4 sm:$0xff]   ;;  %v1560_v14 = vld [vmem:[%s2024_s3 + $0x164] ss:$28 sps:$4 sm:$0xff]  }
  0x54   :  { %v1553_v10 = vld [vmem:[%s2024_s3 + $0xf8] ss:$28 sps:$4 sm:$0xff]   ;;  %v1554_v12 = vld [vmem:[%s2024_s3 + $0x128] ss:$28 sps:$4 sm:$0xff]   ;;  %v1557_v13 = vld [vmem:[%s2024_s3 + $0x130] ss:$28 sps:$4 sm:$0xff]  }
  0x55   :  { %v1558_v15 = vld [vmem:[%s2024_s3 + $0x160] ss:$28 sps:$4 sm:$0xff]   ;;  %v1561_v16 = vld [vmem:[%s2024_s3 + $0x168] ss:$28 sps:$4 sm:$0xff]  }
  0x56   :  { %999 = vmatpush1.bf16.msra.mxu1 %v1510_v18  ;;  %1040 = vmatpush1.bf16.msra.mxu0 %v1513_v19  ;;  %v1564_v17 = vld [vmem:[%s2024_s3 + $0x19c] ss:$28 sps:$4 sm:$0xff]  }
  0x57   :  { %1000 = vmatprep.subr.bf16.mxu1 %v1518_v20  ;;  %1041 = vmatprep.subr.bf16.mxu0 %v1521_v21  ;;  %v1562_v18 = vld [vmem:[%s2024_s3 + $0x198] ss:$28 sps:$4 sm:$0xff]   ;;  %v1565_v19 = vld [vmem:[%s2024_s3 + $0x1a0] ss:$28 sps:$4 sm:$0xff]   ;;  %v667_v20 = vlaneseq  ;;  %s1621_s3 = smov [#allocation2]  }
  0x59   :  { %v668_v21 = vshrl.u32 %v667_v20, 7 }
  0x5a   :  { %1001 = vmatpush1.bf16.msra.mxu1 %v1516_v22  ;;  %1042 = vmatpush1.bf16.msra.mxu0 %v1519_v23 }
  0x5b   :  { %1002 = vmatprep.subr.bf16.mxu1 %v1524_v24  ;;  %1043 = vmatprep.subr.bf16.mxu0 %v1527_v25  ;;  %v669_v22 = vsub.s32 0, %v668_v21  ;;  %v677_v23 = vsub.s32 2, %v668_v21  ;;  %v665_v24 = vld [vmem:[%s2025_s4] sm:$0x7f]  ;;  %v673_v25 = vsub.s32 1, %v668_v21  ;;  %s1208_s4 = sshll.u32 %s1621_s3, 4  ;;  %s1209_s4 = int_to_ptr.vmem [resolvable:$true] %s1208_s4 }
  0x5c   :  { %s1594_s10 = scalar_lea.vmem %s1209_s4, 896  ;;  %p1599_p1 = scmp.lt.s32.totalorder %s1209_s4, %s1209_s4 }
  0x5d   :  { %p1595_p0 = scmp.ne.s32.totalorder %s1209_s4, %s1594_s10  ;;  %p1600_p2 = scmp.lt.s32.totalorder %s1594_s10, %s1594_s10 }
  0x5e   :  { %1003 = vmatpush1.bf16.msra.mxu1 %v1522_v26  ;;  %1044 = vmatpush1.bf16.msra.mxu0 %v1525_v27  ;;  %v681_v26 = vsub.s32 3, %v668_v21  ;;  %v670_v27 = vrot.slane %v665_v24, %v669_v22 }
  0x5f   :  { %1004 = vmatprep.subr.bf16.mxu1 %v1530_v28  ;;  %1045 = vmatprep.subr.bf16.mxu0 %v1533_v29  ;;  %v678_v28 = vrot.slane %v665_v24, %v677_v23  ;;  %v674_v29 = vrot.slane %v665_v24, %v673_v25  ;;  %p1601_p3 = por %p1600_p2, %p1599_p1 }
  0x61   :  { %p1602_p4 = pnand %p1601_p3, %p1595_p0 }
  0x62   :  { %1005 = vmatpush1.bf16.msra.mxu1 %v1528_v30  ;;  %1046 = vmatpush1.bf16.msra.mxu0 %v1531_v31  ;;  %v682_v30 = vrot.slane %v665_v24, %v681_v26 }
  0x63   :  { %1413 = vmatprep.subr.bf16.mxu0 %v1618_v44  ;;  %1072 = vmatprep.subr.bf16.mxu1 %v1536_v32 }
  0xf5   :  { %v1346_v34 = vpop.f32.mrb[0].mxu0 }
  0xf6   :  { %v1347_v36 = vpop.f32.mrb[1].mxu0 }
  0xf7   :  { %v1348_v37 = vadd.f32 %v1347_v36, %v1346_v34  ;;  %v1349_v38 = vpop.f32.mrb[2].mxu0  ;;  %v1368_v39 = vpop.f32.mrb[0].mxu1 }
  0xf8   :  { %v1350_v40 = vpop.f32.mrb[3].mxu0  ;;  %v1369_v42 = vpop.f32.mrb[1].mxu1 }
  0xf9   :  { %v474_v41 = vadd.f32 %v1348_v37, %v1216_v35  ;;  %v1370_v43 = vadd.f32 %v1369_v42, %v1368_v39  ;;  %v1371_v45 = vpop.f32.mrb[2].mxu1 }
  0xfa   :  { %v1372_v46 = vpop.f32.mrb[3].mxu1 }
  0xfb   :  { %v514_v47 = vadd.f32 %v1370_v43, %v474_v41 }
  0xff   :  { %v593_v48 = vpop.f32.mrb[4].mxu1 }
 0x100   :  { %v1411_v49 = vpop.f32.mrb[5].mxu1 }
 0x101   :  { %v596_v50 = vpop.f32.mrb[6].mxu1 }
 0x102   :  { %v1412_v51 = vpop.f32.mrb[7].mxu1 }
 0x115   :  { %v1390_v52 = vpop.f32.mrb[4].mxu0 }
 0x116   :  { %v1391_v53 = vpop.f32.mrb[5].mxu0 }
 0x117   :  { %v1392_v54 = vadd.f32 %v1391_v53, %v1390_v52  ;;  %v1393_v55 = vpop.f32.mrb[6].mxu0 }
 0x118   :  { %v1394_v56 = vpop.f32.mrb[7].mxu0  ;;  %v685_v55 = vsub.s32 4, %v668_v21 }
 0x119   :  { %v554_v57 = vadd.f32 %v1392_v54, %v514_v47  ;;  %v693_v56 = vsub.s32 6, %v668_v21 }
 0x11b   :  { %v594_v58 = vadd.f32 %v593_v48, %v554_v57  ;;  %v689_v57 = vsub.s32 5, %v668_v21 }
 0x11d   :  { %v599_v59 = vmax.f32 %v594_v58, 0.0 }
 0x11f   :  { %v600_v62 = vpack.c.bf16 %v599_v59, %v599_v59 }
 0x121   :  { %1023 = vmatmul.mubr.bf16.vlgmr.msra.gmra.mrb[8].mxu1 %v600_v62  ;;  %1064 = vmatmul.mubr.bf16.vlgmr.msra.gmra.mrb[8].mxu0 %v600_v62 }
 0x122   :  { %1073 = vmatpush1.bf16.msra.mxu1 %v1534_v60  ;;  %1414 = vmatpush3.bf16.msra.mxu0 %v1537_v61  ;;  %v686_v60 = vrot.slane %v665_v24, %v685_v55  ;;  %v694_v61 = vrot.slane %v665_v24, %v693_v56 }
 0x123   :  { %1074 = vmatprep.subr.bf16.mxu1 %v1540_v63  ;;  %1415 = vmatprep.subr.bf16.mxu0 %v1618_v44  ;;  %v690_v63 = vrot.slane %v665_v24, %v689_v57 }
 0x124   :  { %1104 = vmatprep.mubr.bf16.mxu1 %v1620_v33  ;;  %1429 = vmatprep.mubr.msk.bf16.mxu0 %vm1619_vm0, %v1618_v44 }
 0x126   :  { %1075 = vmatpush1.bf16.msra.mxu1 %v1538_v0  ;;  %1416 = vmatpush3.bf16.msra.mxu0 %v1541_v1 }
 0x127   :  { %1076 = vmatprep.subr.bf16.mxu1 %v1544_v2  ;;  %1417 = vmatprep.subr.bf16.mxu0 %v1618_v44 }
 0x12a   :  { %1077 = vmatpush1.bf16.msra.mxu1 %v1542_v3  ;;  %1418 = vmatpush3.bf16.msra.mxu0 %v1545_v4 }
 0x12b   :  { %1078 = vmatprep.subr.bf16.mxu1 %v1548_v5  ;;  %1419 = vmatprep.subr.bf16.mxu0 %v1618_v44 }
 0x12e   :  { %1079 = vmatpush1.bf16.msra.mxu1 %v1546_v6  ;;  %1420 = vmatpush3.bf16.msra.mxu0 %v1549_v7 }
 0x12f   :  { %1080 = vmatprep.subr.bf16.mxu1 %v1552_v8  ;;  %1421 = vmatprep.subr.bf16.mxu0 %v1618_v44 }
 0x132   :  { %1081 = vmatpush1.bf16.msra.mxu1 %v1550_v9  ;;  %1422 = vmatpush3.bf16.msra.mxu0 %v1553_v10 }
 0x133   :  { %1082 = vmatprep.subr.bf16.mxu1 %v1556_v11  ;;  %1423 = vmatprep.subr.bf16.mxu0 %v1618_v44 }
 0x136   :  { %1083 = vmatpush1.bf16.msra.mxu1 %v1554_v12  ;;  %1424 = vmatpush3.bf16.msra.mxu0 %v1557_v13 }
 0x137   :  { %1084 = vmatprep.subr.bf16.mxu1 %v1560_v14  ;;  %1425 = vmatprep.subr.bf16.mxu0 %v1618_v44 }
 0x13a   :  { %1085 = vmatpush1.bf16.msra.mxu1 %v1558_v15  ;;  %1426 = vmatpush3.bf16.msra.mxu0 %v1561_v16 }
 0x13b   :  { %1086 = vmatprep.subr.bf16.mxu1 %v1564_v17  ;;  %1427 = vmatprep.subr.bf16.mxu0 %v1618_v44 }
 0x13e   :  { %1087 = vmatpush1.bf16.msra.mxu1 %v1562_v18  ;;  %1428 = vmatpush3.bf16.msra.mxu0 %v1565_v19 }
 0x141   :  { %1105 = vmatmul.mubr.bf16.vlgmr.msra.gmra.mrb[12].mxu1 %v600_v62  ;;  %1430 = vmatmul.mubr.bf16.vlgmr.msra.gmra.mrb[12].mxu0 %v600_v62 }
 0x1f4   :  { %v1024_v31 = vpop.f32.mrb[8].mxu1  ;;  %v1065_v44 = vpop.f32.mrb[8].mxu0 }
 0x1f5   :  { %v1025_v32 = vadd.f32 %v1024_v31, %v670_v27  ;;  %v1066_v33 = vadd.f32 %v1065_v44, %v678_v28  ;;  %v1026_v34 = vpop.f32.mrb[9].mxu1  ;;  %v1067_v35 = vpop.f32.mrb[9].mxu0 }
 0x1f6   :  { %v1027_v36 = vadd.f32 %v1026_v34, %v674_v29  ;;  %v1068_v37 = vadd.f32 %v1067_v35, %v682_v30  ;;  %v1028_v38 = vpop.f32.mrb[10].mxu1  ;;  %v1069_v39 = vpop.f32.mrb[10].mxu0 }
 0x1f7   :  { %v1323_v40 = vmul.f32 -1.442695, %v1025_v32  ;;  %v1325_v41 = vmul.f32 -1.442695, %v1066_v33  ;;  %v1029_v42 = vpop.f32.mrb[11].mxu1  ;;  %v1070_v43 = vpop.f32.mrb[11].mxu0 }
 0x1f8   :  { %v1324_v45 = vmul.f32 -1.442695, %v1027_v36  ;;  %v1326_v46 = vmul.f32 -1.442695, %v1068_v37 }
 0x1f9   :  { %1566 = vpow2.f32 %v1323_v40 }
 0x1fa   :  { %1568 = vpow2.f32 %v1325_v41 }
 0x1fb   :  { %1570 = vpow2.f32 %v1324_v45 }
 0x1fc   :  { %1572 = vpow2.f32 %v1326_v46 }
 0x203   :  { %v1567_v47 = vpop.eup %1566 }
 0x204   :  { %v1569_v48 = vpop.eup %1568  ;;  %v1174_v49 = vadd.f32 1.0, %v1567_v47 }
 0x205   :  { %v1571_v50 = vpop.eup %1570  ;;  %v1176_v51 = vadd.f32 1.0, %v1569_v48 }
 0x206   :  { %v1573_v52 = vpop.eup %1572  ;;  %1574 = vrcp.f32 %v1174_v49  ;;  %v1175_v53 = vadd.f32 1.0, %v1571_v50 }
 0x207   :  { %1576 = vrcp.f32 %v1176_v51  ;;  %v1177_v54 = vadd.f32 1.0, %v1573_v52 }
 0x208   :  { %1578 = vrcp.f32 %v1175_v53 }
 0x209   :  { %1580 = vrcp.f32 %v1177_v54 }
 0x210   :  { %v1575_v58 = vpop.eup %1574 }
 0x211   :  { %v1577_v59 = vpop.eup %1576  ;;  %1195 = vst [vmem:[#allocation2] sm:$0xff] %v1575_v58 }
 0x212   :  { %v1579_v62 = vpop.eup %1578  ;;  %1197 = vst [vmem:[#allocation2 + $0x10] sm:$0xff] %v1577_v59 }
 0x213   :  { %v1581_v0 = vpop.eup %1580  ;;  %1196 = vst [vmem:[#allocation2 + $0x8] sm:$0xff] %v1579_v62 }
 0x214   :  { %1198 = vst [vmem:[#allocation2 + $0x18] sm:$0xff] %v1581_v0  ;;  %v1106_v1 = vpop.f32.mrb[12].mxu1  ;;  %v1147_v2 = vpop.f32.mrb[12].mxu0 }
 0x215   :  { %v1107_v3 = vadd.f32 %v1106_v1, %v686_v60  ;;  %v1148_v4 = vadd.f32 %v1147_v2, %v694_v61  ;;  %v1108_v5 = vpop.f32.mrb[13].mxu1  ;;  %v1431_v6 = vpop.f32.mrb[13].mxu0 }
 0x216   :  { %v1109_v7 = vadd.f32 %v1108_v5, %v690_v63  ;;  %v1110_v8 = vpop.f32.mrb[14].mxu1  ;;  %v1150_v9 = vpop.f32.mrb[14].mxu0 }
 0x217   :  { %v1327_v10 = vmul.f32 -1.442695, %v1107_v3  ;;  %v1329_v11 = vmul.f32 -1.442695, %v1148_v4  ;;  %v1111_v12 = vpop.f32.mrb[15].mxu1  ;;  %v1432_v13 = vpop.f32.mrb[15].mxu0 }
 0x218   :  { %v1328_v14 = vmul.f32 -1.442695, %v1109_v7 }
 0x219   :  { %1582 = vpow2.f32 %v1327_v10 }
 0x21a   :  { %1584 = vpow2.f32 %v1329_v11 }
 0x21b   :  { %1586 = vpow2.f32 %v1328_v14 }
 0x223   :  { %v1583_v15 = vpop.eup %1582 }
 0x224   :  { %v1585_v16 = vpop.eup %1584  ;;  %v1178_v17 = vadd.f32 1.0, %v1583_v15 }
 0x225   :  { %v1587_v18 = vpop.eup %1586  ;;  %v1180_v19 = vadd.f32 1.0, %v1585_v16 }
 0x226   :  { %1588 = vrcp.f32 %v1178_v17  ;;  %v1179_v20 = vadd.f32 1.0, %v1587_v18 }
 0x227   :  { %1590 = vrcp.f32 %v1180_v19 }
 0x228   :  { %1592 = vrcp.f32 %v1179_v20 }
 0x230   :  { %v1589_v21 = vpop.eup %1588 }
 0x231   :  { %v1591_v22 = vpop.eup %1590  ;;  %1199 = vst [vmem:[#allocation2 + $0x20] sm:$0xff] %v1589_v21 }
 0x232   :  { %v1593_v23 = vpop.eup %1592  ;;  %1201 = vst.msk [vmem:[#allocation2 + $0x30] sm:$0xff] %vm435_vm1, %v1591_v22 }
 0x233   :  { %1200 = vst [vmem:[#allocation2 + $0x28] sm:$0xff] %v1593_v23 }
 0x234   :  { %1605 = shalt.err (!%p1602_p4)
}
 0x235   :  { %s1606_s12 = scalar_lea.hbm %s2026_s5, 896 }
 0x236   :  { %p1607_p5 = scmp.ne.s32.totalorder %s2026_s5, %s1606_s12  ;;  %p1610_p6 = scmp.lt.u32.totalorder %s1606_s12, %s2026_s5 }
 0x238   :  { %p1612_p7 = pnand %p1610_p6, %p1607_p5 }
 0x23a   :  { %1615 = shalt.err (!%p1612_p7)
}
 0x23b   :  { %1211 = dma.vmem_to_hbm [thread:$0]  %s1209_s4, 896, %s2026_s5, [#allocation3]  }
 0x23c   :  { %1616 = dma.done.wait [#allocation3], 896  }
 0x23d   :  { %1617 = vsyncadd [#allocation3], 4294966400 }
 0x23e   :  { %1215 = vsyncpa [#allocation3], 1 }

</bundles_post_ra>
